<compile_context>
chip_gen: v7x
topology: tpu7x:2x2x1
jax: 0.10.0
libtpu: 0.0.40
codegen_flags: <defaults>
</compile_context>

<pallas_src>
import functools

import jax
import jax.numpy as jnp
from jax.experimental import pallas as pl
from jax.experimental.pallas import tpu as pltpu

SELU_ALPHA = 1.6732632423543772
SELU_SCALE = 1.0507009873554805


def _mlp_kernel(x_ref, w1_ref, b1_ref, w2row_ref, scal_ref, wm_ref, o_ref,
                acc_ref, *, apply_sigmoid, approx_sigmoid):
    k = pl.program_id(1)

    @pl.when(k == 0)
    def _():
        acc_ref[...] = jnp.zeros_like(acc_ref)

    # First linear on the MXU: the x tile is cast to bf16 here (so the wrapper
    # never rewrites x in HBM); w1 arrives already in bf16; f32 accumulate.
    acc_ref[...] += jnp.dot(x_ref[...].astype(jnp.bfloat16), w1_ref[...],
                            preferred_element_type=jnp.float32)

    @pl.when(k == pl.num_programs(1) - 1)
    def _():
        l1 = acc_ref[...] + b1_ref[...]                      # (tile_b, H) f32

        # SELU: exp only of the clamped-negative branch (EUP slot, no inf).
        neg = SELU_ALPHA * (jnp.exp(jnp.minimum(l1, 0.0)) - 1.0)
        l2 = SELU_SCALE * jnp.where(l1 > 0.0, l1, neg)

        # Dropout: identity in eval mode.
        # TODO(synk): training-mode dropout not implemented (eval semantics).

        # Second linear fused with concat([l2, wm], dim=1):
        #   out[b] = sum_h l2[b,h]*w2[h] + wm[b]*w2_wm + b2
        # VPU multiply + lane reduce -> (tile_b, 1); no transpose of l2, and
        # the MXU stays dedicated to the first (dominant) matmul.
        out = jnp.sum(l2 * w2row_ref[...], axis=-1, keepdims=True)
        out = out + wm_ref[...] * scal_ref[0] + scal_ref[1]

        if apply_sigmoid:                       # task == 'sex_predict'
            if approx_sigmoid:
                out = pl.reciprocal(1.0 + jnp.exp(-out), approx=True)
            else:
                out = 1.0 / (1.0 + jnp.exp(-out))
        o_ref[...] = out                        # task == 'age_predict' -> logit


def _round_up(a, m):
    return ((a + m - 1) // m) * m


def mlp_forward(x, wm, params, task="sex_predict", tile_b=None, tile_k=None,
                approx_sigmoid=True):
    """x: (B, ...) flattened to (B, D); wm: (B,) or (B, 1).  Returns (B,).

    Numerics: the first matmul runs in bf16 (f32 accumulate) and, by default,
    the sigmoid uses an approximate EUP reciprocal; set approx_sigmoid=False
    for the exact form.  Dropout is eval-mode identity.
    """
    if task not in ("sex_predict", "age_predict"):
        raise ValueError(task)

    w1, b1, w2, b2 = params["w1"], params["b1"], params["w2"], params["b2"]
    B = x.shape[0]
    x2 = x.reshape(B, -1)                  # metadata-only (mimics x.view)
    D = x2.shape[1]
    H = w1.shape[1]                        # D // 4

    # Tiny operands prepared on the host side (O(D*H) at most for w1; callers
    # that run this every step should store params["w1"] in bf16 already).
    w1_bf = w1 if w1.dtype == jnp.bfloat16 else w1.astype(jnp.bfloat16)
    b1_row = b1.reshape(1, H).astype(jnp.float32)
    w2row = w2[:H, 0].reshape(1, H).astype(jnp.float32)
    scal = jnp.stack([w2[H, 0], b2[0]]).astype(jnp.float32)   # [w2_wm, b2] -> SMEM
    wm2 = wm.reshape(B, 1).astype(jnp.float32)

    # ---- generation-aware VMEM budget (v5e/v6e: 128 MiB, v7x: 64 MiB/TC) ----
    try:
        vmem_cap = int(pltpu.get_tpu_info().vmem_capacity_bytes)
    except Exception:
        vmem_cap = 64 * 1024 * 1024        # conservative default (v7x per-TC)
    vmem_limit = min(int(vmem_cap * 0.8), 100 * 1024 * 1024)

    # ---- contraction (K) tiling: only when w1 cannot stay resident ----------
    w1_budget = vmem_limit // 3
    if tile_k is None:
        if D * H * 2 <= w1_budget or D % 128 != 0:
            tile_k = D
        else:
            divs = [c * 128 for c in range(1, D // 128 + 1) if D % (c * 128) == 0]
            fitting = [d for d in divs if d * H * 2 <= w1_budget]
            tile_k = max(fitting) if fitting else min(divs)
    if D % tile_k != 0:
        raise ValueError("tile_k must divide the flattened input dim")
    nk = D // tile_k

    # ---- batch tiling: fill the VMEM budget, keep >=2 tiles for megacore ----
    x_itemsize = jnp.dtype(x2.dtype).itemsize
    if tile_b is None:
        w1_resident = tile_k * H * 2 * (1 if nk == 1 else 2)
        avail = max(int(vmem_limit * 0.75) - w1_resident, 1 << 20)
        per_row = tile_k * x_itemsize * 2 + H * 4 * 2 + 32   # 2 x-bufs + acc + temps
        tile_b = max(avail // per_row, 8)
        tile_b = min(tile_b, 2048)
        tile_b = (tile_b // 128) * 128 if tile_b >= 128 else (tile_b // 8) * 8
        tile_b = min(tile_b, _round_up(B, 8))                # don't overshoot B
        if B > 128:                                          # 2 TCs on v7x need >=2 tiles
            tile_b = min(tile_b, _round_up(pl.cdiv(B, 2), 128))
        tile_b = max(tile_b, 8)
    if tile_b % 8 != 0:
        raise ValueError("tile_b must be a multiple of 8")
    nb = pl.cdiv(B, tile_b)

    x_block_bytes = tile_b * tile_k * x_itemsize
    x_buffers = 3 if x_block_bytes < (1 << 20) else None     # deeper buffering for tiny tiles

    kernel = functools.partial(_mlp_kernel,
                               apply_sigmoid=(task == "sex_predict"),
                               approx_sigmoid=approx_sigmoid)

    def build(use_pipeline_mode):
        def spec(shape, index_map, *, memory_space=None, buffers=None):
            kw = {}
            if memory_space is not None:
                kw["memory_space"] = memory_space
            if use_pipeline_mode and buffers is not None:
                return pl.BlockSpec(shape, index_map,
                                    pipeline_mode=pl.Buffered(buffers), **kw)
            return pl.BlockSpec(shape, index_map, **kw)

        in_specs = [
            spec((tile_b, tile_k), lambda i, k: (i, k), buffers=x_buffers),     # x
            spec((tile_k, H), lambda i, k: (k, 0),
                 buffers=1 if nk == 1 else None),                               # w1 (bf16)
            spec((1, H), lambda i, k: (0, 0), buffers=1),                       # b1
            spec((1, H), lambda i, k: (0, 0), buffers=1),                       # w2 row
            spec((2,), lambda i, k: (0,),
                 memory_space=pltpu.MemorySpace.SMEM),                          # [w2_wm, b2]
            spec((tile_b, 1), lambda i, k: (i, 0)),                             # wm
        ]
        out_spec = spec((tile_b, 1), lambda i, k: (i, 0))

        return pl.pallas_call(
            kernel,
            out_shape=jax.ShapeDtypeStruct((B, 1), jnp.float32),
            grid=(nb, nk),
            in_specs=in_specs,
            out_specs=out_spec,
            scratch_shapes=[pltpu.VMEM((tile_b, H), jnp.float32)],   # f32 accumulator
            compiler_params=pltpu.CompilerParams(
                dimension_semantics=("parallel", "arbitrary"),
                vmem_limit_bytes=vmem_limit,
            ),
        )

    args = (x2, w1_bf, b1_row, w2row, scal, wm2)
    try:
        out = build(True)(*args)
    except Exception:
        # Older JAX without BlockSpec(pipeline_mode=...) / pl.Buffered support:
        # identical kernel, default buffering.  (A genuine kernel bug would
        # re-raise from this second attempt.)
        out = build(False)(*args)

    return out[:, 0]


def init_params(key, input_dim):
    """Deterministic init mimicking nn.Linear defaults (uniform +-1/sqrt(fan_in))."""
    hidden = input_dim // 4
    k1, k2, k3, k4 = jax.random.split(key, 4)
    bound1 = 1.0 / jnp.sqrt(input_dim)
    bound2 = 1.0 / jnp.sqrt(hidden + 1)
    return {
        "w1": jax.random.uniform(k1, (input_dim, hidden), jnp.float32, -bound1, bound1),
        "b1": jax.random.uniform(k2, (hidden,), jnp.float32, -bound1, bound1),
        "w2": jax.random.uniform(k3, (hidden + 1, 1), jnp.float32, -bound2, bound2),
        "b2": jax.random.uniform(k4, (1,), jnp.float32, -bound2, bound2),
    }


def _ref_forward(x, wm, p, task):
    """Pure-JAX f32 reference of the PyTorch forward (eval mode)."""
    x1 = x.reshape(x.shape[0], -1)
    l1 = x1 @ p["w1"] + p["b1"]
    l2 = jax.nn.selu(l1)
    l2 = jnp.concatenate([l2, wm.reshape(-1, 1)], axis=1)
    out = l2 @ p["w2"] + p["b2"]
    if task == "sex_predict":
        out = jax.nn.sigmoid(out)
    return out.reshape(out.shape[0])


if __name__ == "__main__":
    key = jax.random.PRNGKey(0)
    kx, kw, kp, kx2, kw2, kp2 = jax.random.split(key, 6)

    # ---- config 1: D = 64 (H = 16), single-K path, both tasks ----
    B = 8
    D = 4 * 4 * 4
    x = jax.random.normal(kx, (B, 4, 4, 4), jnp.float32)
    wm = jax.random.normal(kw, (B, 1), jnp.float32)
    params = init_params(kp, D)

    pred = mlp_forward(x, wm, params, task="sex_predict")
    jax.block_until_ready(pred)
    assert pred.shape == (B,)
    assert bool(jnp.all((pred >= 0.0) & (pred <= 1.0)))
    assert bool(jnp.allclose(pred, _ref_forward(x, wm, params, "sex_predict"),
                             atol=5e-2, rtol=5e-2))

    logit = mlp_forward(x, wm, params, task="age_predict")
    jax.block_until_ready(logit)
    assert logit.shape == (B,)
    assert bool(jnp.allclose(logit, _ref_forward(x, wm, params, "age_predict"),
                             atol=5e-2, rtol=5e-2))

    # ---- config 2: D = 256 (H = 64), forced K-tiling (tile_k=128 -> nk=2) ----
    B2 = 16
    D2 = 4 * 8 * 8
    xb = jax.random.normal(kx2, (B2, 4, 8, 8), jnp.float32)
    wmb = jax.random.normal(kw2, (B2, 1), jnp.float32)
    params_b = init_params(kp2, D2)

    pred_b = mlp_forward(xb, wmb, params_b, task="sex_predict", tile_k=128)
    jax.block_until_ready(pred_b)
    assert pred_b.shape == (B2,)
    assert bool(jnp.allclose(pred_b, _ref_forward(xb, wmb, params_b, "sex_predict"),
                             atol=5e-2, rtol=5e-2))

    print("KERNEL_OK")
</pallas_src>

<mosaic_0001>
module attributes {stable_mosaic.version = 11 : i64} {
  func.func @_mlp_kernel(%arg0: i32, %arg1: i32, %arg2: memref<8x64xf32, #tpu.memory_space<vmem>>, %arg3: memref<64x16xbf16, #tpu.memory_space<vmem>>, %arg4: memref<1x16xf32, #tpu.memory_space<vmem>>, %arg5: memref<1x16xf32, #tpu.memory_space<vmem>>, %arg6: memref<2xf32, #tpu.memory_space<smem>>, %arg7: memref<8x1xf32, #tpu.memory_space<vmem>>, %arg8: memref<8x1xf32, #tpu.memory_space<vmem>>, %arg9: memref<8x16xf32, #tpu.memory_space<vmem>>) attributes {dimension_semantics = [#tpu.dimension_semantics<parallel>, #tpu.dimension_semantics<arbitrary>], iteration_bounds = array<i64: 1, 1>, scalar_prefetch = 0 : i64, scratch_operands = 1 : i64, tpu.core_type = #tpu.core_type<tc>, window_params = [{transform_indices = @transform_0, window_bounds = array<i64: 8, 64>}, {transform_indices = @transform_1, window_bounds = array<i64: 64, 16>}, {pipeline_mode = #tpu.pipeline_mode<synchronous>, transform_indices = @transform_2, window_bounds = array<i64: 1, 16>}, {pipeline_mode = #tpu.pipeline_mode<synchronous>, transform_indices = @transform_3, window_bounds = array<i64: 1, 16>}, {transform_indices = @transform_4, window_bounds = array<i64: 2>}, {transform_indices = @transform_5, window_bounds = array<i64: 8, 1>}, {transform_indices = @transform_6, window_bounds = array<i64: 8, 1>}]} {
    %c0_i32 = arith.constant 0 : i32
    %0 = arith.cmpi eq, %arg1, %c0_i32 : i32
    %1 = arith.extui %0 : i1 to i32
    %c0_i32_0 = arith.constant 0 : i32
    %2 = arith.cmpi ne, %1, %c0_i32_0 : i32
    scf.if %2 {
      %cst_10 = arith.constant 0.000000e+00 : f32
      %13 = vector.broadcast %cst_10 : f32 to vector<8x16xf32>
      %c0_11 = arith.constant 0 : index
      %c0_12 = arith.constant 0 : index
      %14 = vector.load %arg9[%c0_11, %c0_12] : memref<8x16xf32, #tpu.memory_space<vmem>>, vector<8x16xf32>
      tpu.vector_store %arg9[%c0_11, %c0_12], %13 {strides = array<i32>} : memref<8x16xf32, #tpu.memory_space<vmem>>, vector<8x16xf32>,
    } else {
    }
    %c0 = arith.constant 0 : index
    %c0_1 = arith.constant 0 : index
    %3 = vector.load %arg9[%c0, %c0_1] : memref<8x16xf32, #tpu.memory_space<vmem>>, vector<8x16xf32>
    %c0_2 = arith.constant 0 : index
    %c0_3 = arith.constant 0 : index
    %4 = vector.load %arg2[%c0_2, %c0_3] : memref<8x64xf32, #tpu.memory_space<vmem>>, vector<8x64xf32>
    %5 = arith.truncf %4 : vector<8x64xf32> to vector<8x64xbf16>
    %c0_4 = arith.constant 0 : index
    %c0_5 = arith.constant 0 : index
    %6 = vector.load %arg3[%c0_4, %c0_5] : memref<64x16xbf16, #tpu.memory_space<vmem>>, vector<64x16xbf16>
    %cst = arith.constant dense<0.000000e+00> : vector<8x16xf32>
    %7 = tpu.matmul %5, %6, %cst {dimension_numbers = #tpu.dot_dimension_numbers<[1], [0], [0], [1], [0, 0, 1, 1], [], []>} : vector<8x64xbf16>, vector<64x16xbf16>, vector<8x16xf32> -> vector<8x16xf32>
    %8 = arith.addf %3, %7 : vector<8x16xf32>
    %c0_6 = arith.constant 0 : index
    %c0_7 = arith.constant 0 : index
    %9 = vector.load %arg9[%c0_6, %c0_7] : memref<8x16xf32, #tpu.memory_space<vmem>>, vector<8x16xf32>
    tpu.vector_store %arg9[%c0_6, %c0_7], %8 {strides = array<i32>} : memref<8x16xf32, #tpu.memory_space<vmem>>, vector<8x16xf32>,
    %c0_i32_8 = arith.constant 0 : i32
    %10 = arith.cmpi eq, %arg1, %c0_i32_8 : i32
    %11 = arith.extui %10 : i1 to i32
    %c0_i32_9 = arith.constant 0 : i32
    %12 = arith.cmpi ne, %11, %c0_i32_9 : i32
    scf.if %12 {
      %c0_10 = arith.constant 0 : index
      %c0_11 = arith.constant 0 : index
      %13 = vector.load %arg9[%c0_10, %c0_11] : memref<8x16xf32, #tpu.memory_space<vmem>>, vector<8x16xf32>
      %c0_12 = arith.constant 0 : index
      %c0_13 = arith.constant 0 : index
      %14 = vector.load %arg4[%c0_12, %c0_13] : memref<1x16xf32, #tpu.memory_space<vmem>>, vector<1x16xf32>
      %15 = vector.broadcast %14 : vector<1x16xf32> to vector<8x16xf32>
      %16 = arith.addf %13, %15 : vector<8x16xf32>
      %cst_14 = arith.constant 0.000000e+00 : f32
      %17 = vector.broadcast %cst_14 : f32 to vector<8x16xf32>
      %18 = arith.minimumf %16, %17 : vector<8x16xf32>
      %19 = math.exp %18 : vector<8x16xf32>
      %cst_15 = arith.constant 1.000000e+00 : f32
      %20 = vector.broadcast %cst_15 : f32 to vector<8x16xf32>
      %21 = arith.subf %19, %20 : vector<8x16xf32>
      %cst_16 = arith.constant 1.67326319 : f32
      %22 = vector.broadcast %cst_16 : f32 to vector<8x16xf32>
      %23 = arith.mulf %22, %21 : vector<8x16xf32>
      %cst_17 = arith.constant 0.000000e+00 : f32
      %24 = vector.broadcast %cst_17 : f32 to vector<8x16xf32>
      %25 = arith.cmpf ogt, %16, %24 : vector<8x16xf32>
      %26 = arith.select %25, %16, %23 : vector<8x16xi1>, vector<8x16xf32>
      %cst_18 = arith.constant 1.05070102 : f32
      %27 = vector.broadcast %cst_18 : f32 to vector<8x16xf32>
      %28 = arith.mulf %27, %26 : vector<8x16xf32>
      %c0_19 = arith.constant 0 : index
      %c0_20 = arith.constant 0 : index
      %29 = vector.load %arg5[%c0_19, %c0_20] : memref<1x16xf32, #tpu.memory_space<vmem>>, vector<1x16xf32>
      %30 = vector.broadcast %29 : vector<1x16xf32> to vector<8x16xf32>
      %31 = arith.mulf %28, %30 : vector<8x16xf32>
      %cst_21 = arith.constant dense<0.000000e+00> : vector<8xf32>
      %32 = vector.multi_reduction <add>, %31, %cst_21 [1] : vector<8x16xf32> to vector<8xf32>
      %33 = vector.shape_cast %32 : vector<8xf32> to vector<8x1xf32>
      %c0_22 = arith.constant 0 : index
      %c0_23 = arith.constant 0 : index
      %34 = vector.load %arg7[%c0_22, %c0_23] : memref<8x1xf32, #tpu.memory_space<vmem>>, vector<8x1xf32>
      %c0_24 = arith.constant 0 : index
      %35 = memref.load %arg6[%c0_24] : memref<2xf32, #tpu.memory_space<smem>>
      %36 = vector.broadcast %35 : f32 to vector<8x1xf32>
      %37 = arith.mulf %34, %36 : vector<8x1xf32>
      %38 = arith.addf %33, %37 : vector<8x1xf32>
      %c1 = arith.constant 1 : index
      %39 = memref.load %arg6[%c1] : memref<2xf32, #tpu.memory_space<smem>>
      %40 = vector.broadcast %39 : f32 to vector<8x1xf32>
      %41 = arith.addf %38, %40 : vector<8x1xf32>
      %cst_25 = arith.constant 0.000000e+00 : f32
      %42 = vector.broadcast %cst_25 : f32 to vector<8x1xf32>
      %43 = arith.subf %42, %41 : vector<8x1xf32>
      %44 = math.exp %43 : vector<8x1xf32>
      %cst_26 = arith.constant 1.000000e+00 : f32
      %45 = vector.broadcast %cst_26 : f32 to vector<8x1xf32>
      %46 = arith.addf %45, %44 : vector<8x1xf32>
      %47 = tpu.reciprocal %46 {approx = true} : vector<8x1xf32> -> vector<8x1xf32>
      %c0_27 = arith.constant 0 : index
      %c0_28 = arith.constant 0 : index
      %48 = vector.load %arg8[%c0_27, %c0_28] : memref<8x1xf32, #tpu.memory_space<vmem>>, vector<8x1xf32>
      tpu.vector_store %arg8[%c0_27, %c0_28], %47 {strides = array<i32>} : memref<8x1xf32, #tpu.memory_space<vmem>>, vector<8x1xf32>,
    } else {
    }
    return
  }
  func.func @transform_0(%arg0: i32, %arg1: i32) -> (i32, i32) {
    %c0_i32 = arith.constant 0 : i32
    return %arg0, %arg1 : i32, i32
  }
  func.func @transform_1(%arg0: i32, %arg1: i32) -> (i32, i32) {
    %c0_i32 = arith.constant 0 : i32
    %c0_i32_0 = arith.constant 0 : i32
    return %arg1, %c0_i32 : i32, i32
  }
  func.func @transform_2(%arg0: i32, %arg1: i32) -> (i32, i32) {
    %c0_i32 = arith.constant 0 : i32
    %c0_i32_0 = arith.constant 0 : i32
    %c0_i32_1 = arith.constant 0 : i32
    return %c0_i32, %c0_i32_0 : i32, i32
  }
  func.func @transform_3(%arg0: i32, %arg1: i32) -> (i32, i32) {
    %c0_i32 = arith.constant 0 : i32
    %c0_i32_0 = arith.constant 0 : i32
    %c0_i32_1 = arith.constant 0 : i32
    return %c0_i32, %c0_i32_0 : i32, i32
  }
  func.func @transform_4(%arg0: i32, %arg1: i32) -> i32 {
    %c0_i32 = arith.constant 0 : i32
    %c0_i32_0 = arith.constant 0 : i32
    return %c0_i32 : i32
  }
  func.func @transform_5(%arg0: i32, %arg1: i32) -> (i32, i32) {
    %c0_i32 = arith.constant 0 : i32
    %c0_i32_0 = arith.constant 0 : i32
    return %arg0, %c0_i32 : i32, i32
  }
  func.func @transform_6(%arg0: i32, %arg1: i32) -> (i32, i32) {
    %c0_i32 = arith.constant 0 : i32
    %c0_i32_0 = arith.constant 0 : i32
    return %arg0, %c0_i32 : i32, i32
  }
}

</mosaic_0001>

<bundles_post_ra>
// kernel: tpu_custom_call.1
= control target key start
LH: loop header
LB: loop body
LE: loop exit
PB: predicated region body
PF: predicated region fallthrough
CT: control target
= control target key end

     0   :  { %11 = vsyncpa [#allocation4], 0  ;;  %s300_s0 = inlined_call_operand.vmem [shape: f32[8,64], index: 0, kind: input, shape index: {}]   ;;  %s301_s1 = inlined_call_operand.vmem [shape: bf16[64,16], index: 1, kind: input, shape index: {}]   ;;  %s302_s2 = inlined_call_operand.vmem [shape: f32[1,16], index: 2, kind: input, shape index: {}]   ;;  %s303_s3 = inlined_call_operand.vmem [shape: f32[1,16], index: 3, kind: input, shape index: {}]   ;;  %s304_s4 = inlined_call_operand.vmem [shape: f32[2], index: 4, kind: input, shape index: {}]   ;;  %s305_s5 = inlined_call_operand.vmem [shape: f32[8,1], index: 5, kind: input, shape index: {}]   ;;  %s306_s6 = inlined_call_operand.vmem [shape: f32[8,1], index: 6, kind: output, shape index: {}]  }
   0x1   :  { %s26_s23 = sshll.u32 %s304_s4, 4  ;;  %s27_s23 = int_to_ptr.vmem [resolvable:$true] %s26_s23 }
   0x2   :  { %s215_s24 = scalar_lea.vmem %s27_s23, 16  ;;  %p220_p1 = scmp.lt.s32.totalorder %s27_s23, %s27_s23 }
   0x3   :  { %p216_p0 = scmp.ne.s32.totalorder %s27_s23, %s215_s24  ;;  %p221_p2 = scmp.lt.s32.totalorder %s215_s24, %s215_s24 }
   0x5   :  { %p222_p3 = por %p221_p2, %p220_p1 }
   0x7   :  { %p223_p4 = pnand %p222_p3, %p216_p0 }
   0x9   :  { %226 = shalt.err (!%p223_p4)
}
   0xa   :  { %s229_s25 = smov [#allocation3]  }
   0xb   :  { %29 = dma.vmem_to_smem %s27_s23, 16, %s229_s25, [#allocation4]  }
   0xc   :  { %227 = dma.done.wait [#allocation4], 16  }
   0xd   :  { %228 = vsyncadd [#allocation4], 4294967280 }
   0xe   :  { %35 = sfence }
   0xf   :  { %v205_v0 = vld [vmem:[%s301_s1] sm:$0xff]   ;;  %v230_v1 = vmov 0.0   ;;  %v206_v2 = vld [vmem:[%s301_s1 + $0x8] sm:$0xff]   ;;  %vm231_vm0 = vmmov 0   ;;  %vm41_vm1 = vcmask 130048   ;;  %v207_v3 = vld [vmem:[%s301_s1 + $0x10] sm:$0xff]  }
  0x10   :  { %190 = vmatprep.subr.bf16.mxu0 %v230_v1  ;;  %198 = vmatprep.mubr.msk.bf16.mxu0 %vm231_vm0, %v230_v1  ;;  %42 = vst.msk [vmem:[#allocation2] sm:$0xff] %vm41_vm1, %v230_v1  ;;  %v208_v4 = vld [vmem:[%s301_s1 + $0x18] sm:$0xff]   ;;  %v44_v5 = vld [vmem:[%s300_s0] sm:$0xff]  ;;  %vm78_vm2 = vcmask 523264   ;;  %s184_s13 = sld [smem:[#allocation3 + $0x1]]  ;;  %vm169_vm4 = vcmask 7168  }
  0x11   :  { %191 = vmatpush3.bf16.msra.mxu0 %v205_v0  ;;  %v45_v6 = vpack.c.bf16 %v44_v5, %v44_v5  ;;  %v181_v13 = vld [vmem:[%s302_s2] ss:$0 sm:$0xff]  ;;  %s157_s2 = sld [smem:[#allocation3]] }
  0x12   :  { %192 = vmatprep.subr.bf16.mxu0 %v230_v1  ;;  %v183_v22 = vld [vmem:[%s303_s3] ss:$0 sm:$0xff] }
  0x13   :  { %v156_v26 = vld [vmem:[%s305_s5] sm:$0xff] }
  0x15   :  { %193 = vmatpush3.bf16.msra.mxu0 %v206_v2 }
  0x16   :  { %194 = vmatprep.subr.bf16.mxu0 %v230_v1  ;;  %v162_v30 = vstv %s184_s13 }
  0x17   :  { %v43_v7 = vld [vmem:[#allocation2] sm:$0xff]  ;;  %v158_v27 = vstv %s157_s2 }
  0x18   :  { %v159_v28 = vmul.f32 %v158_v27, %v156_v26 }
  0x19   :  { %195 = vmatpush3.bf16.msra.mxu0 %v207_v3 }
  0x1a   :  { %196 = vmatprep.subr.bf16.mxu0 %v230_v1 }
  0x1d   :  { %197 = vmatpush3.bf16.msra.mxu0 %v208_v4 }
  0x20   :  { %199 = vmatmul.mubr.msk.bf16.vlgmr.msra.gmra.mrb[0].mxu0 %vm78_vm2, %v45_v6 }
  0xf3   :  { %v116_v8 = vpop.f32.mrb[0].mxu0 }
  0xf4   :  { %v122_v9 = vadd.f32 %v116_v8, %v43_v7  ;;  %v200_v10 = vpop.f32.mrb[1].mxu0 }
  0xf5   :  { %v119_v11 = vpop.f32.mrb[2].mxu0 }
  0xf6   :  { %124 = vst.msk [vmem:[#allocation2] sm:$0xff] %vm41_vm1, %v122_v9  ;;  %v201_v12 = vpop.f32.mrb[3].mxu0 }
  0xfd   :  { %v128_v14 = vld [vmem:[#allocation2] sm:$0xff] }
  0xfe   :  { %v136_v15 = vadd.f32 %v181_v13, %v128_v14 }
 0x100   :  { %v137_v16 = vmin.f32 %v136_v15, 0.0  ;;  %vm142_vm3 = vcmp.gt.f32.partialorder %v136_v15, 0.0 }
 0x102   :  { %v138_v17 = vmul.f32 1.442695, %v137_v16 }
 0x104   :  { %209 = vpow2.f32 %v138_v17 }
 0x10e   :  { %v210_v18 = vpop.eup %209 }
 0x10f   :  { %v182_v19 = vadd.f32 -1.0, %v210_v18 }
 0x111   :  { %v141_v20 = vmul.f32 1.6732632, %v182_v19 }
 0x113   :  { %v143_v21 = vsel %vm142_vm3, %v136_v15, %v141_v20 }
 0x114   :  { %v144_v23 = vmul.f32 1.050701, %v143_v21 }
 0x116   :  { %v152_v24 = vmul.f32 %v183_v22, %v144_v23 }
 0x118   :  { %v153_v25 = vsel %vm41_vm1, %v152_v24, 0.0 }
 0x119   :  { %154 = vadd.xlane.f32.xlu0 %v153_v25 }
 0x1a6   :  { %v155_v29 = vpop.xlane.xlu0 %154 }
 0x1a7   :  { %v160_v31 = vadd.f32 %v159_v28, %v155_v29 }
 0x1a9   :  { %v163_v32 = vadd.f32 %v162_v30, %v160_v31 }
 0x1ab   :  { %v164_v33 = vsub.f32 0.0, %v163_v32 }
 0x1ad   :  { %v165_v34 = vmul.f32 1.442695, %v164_v33 }
 0x1af   :  { %211 = vpow2.f32 %v165_v34 }
 0x1b9   :  { %v212_v35 = vpop.eup %211 }
 0x1ba   :  { %v167_v36 = vadd.f32 1.0, %v212_v35 }
 0x1bc   :  { %213 = vrcp.f32 %v167_v36 }
 0x1c6   :  { %v214_v37 = vpop.eup %213 }
 0x1c7   :  { %170 = vst.msk [vmem:[%s306_s6] sm:$0xff] %vm169_vm4, %v214_v37 }
 0x1c8   :  { %175 = vsyncpa [#allocation4], 1 }

</bundles_post_ra>
